<compile_context>
chip_gen: v6e
topology: v6e:2x2x1
jax: 0.10.0
libtpu: 0.0.40
codegen_flags: <defaults>
</compile_context>

<pallas_src>
import jax
import jax.numpy as jnp
from jax.experimental import pallas as pl
from jax.experimental.pallas import tpu as pltpu

_LANE = 128
_SUBLANE = 8
_MAX_BLOCK_BYTES = 1 << 20  # ~1 MiB per block buffer -> <= ~4 MiB VMEM total
                            # (in + out, double-buffered); safe on all chips.


def _copy_kernel(x_ref, o_ref):
    # BottleBlock.forward(x) == x (the conv stack from __init__ is unused).
    o_ref[...] = x_ref[...]


def bottleblock_forward(x, params=None):
    """Pallas implementation of BottleBlock.forward (identity).

    Args:
      x: jnp.ndarray of shape (N, C, H, W)  # NCHW, PyTorch convention
      params: ignored (the PyTorch forward never uses the conv stack)
    Returns:
      jnp.ndarray identical to x (same shape, dtype, values).
    """
    orig_shape = x.shape
    total = int(x.size)
    itemsize = jnp.dtype(x.dtype).itemsize

    # ---- choose a lane-dense 2D slab: cols a multiple of 128, rows a
    #      multiple of 8 (pad the flat data if element count doesn't allow it)
    flat = x.reshape(-1)
    cols = None
    for cand in (2048, 1024, 512, 256, 128):
        if total % cand == 0 and (total // cand) % _SUBLANE == 0:
            cols = cand
            break
    if cols is None:
        # Pad up to the next multiple of 8*128 so every store is a full,
        # unmasked 128-lane vst (no lane-sparse fallback path).
        cols = _LANE
        chunk = _SUBLANE * _LANE
        padded_total = pl.cdiv(total, chunk) * chunk
        flat = jnp.pad(flat, (0, padded_total - total))
    rows = flat.size // cols
    x2d = flat.reshape(rows, cols)

    # ---- row tiling: keep each block ~1 MiB, TR a multiple of 8 -------------
    tr = (_MAX_BLOCK_BYTES // (cols * itemsize)) // _SUBLANE * _SUBLANE
    tr = max(_SUBLANE, tr)
    tr = min(tr, rows)
    grid = (pl.cdiv(rows, tr),)

    out2d = pl.pallas_call(
        _copy_kernel,
        out_shape=jax.ShapeDtypeStruct((rows, cols), x.dtype),
        grid_spec=pltpu.PrefetchScalarGridSpec(
            num_scalar_prefetch=0,
            grid=grid,
            in_specs=[pl.BlockSpec((tr, cols), lambda i: (i, 0))],
            out_specs=pl.BlockSpec((tr, cols), lambda i: (i, 0)),
        ),
        # Alias input 0 -> output 0: lets XLA donate the buffer so the
        # identity "copy" carries no extra HBM allocation.
        input_output_aliases={0: 0},
        compiler_params=pltpu.CompilerParams(
            # No reduction axis: 'parallel' lets v7x shard rows across both
            # TensorCores; neutral (harmless) on v5e / v6e.
            dimension_semantics=("parallel",),
        ),
    )(x2d)

    out_flat = out2d.reshape(-1)
    if out_flat.size != total:
        out_flat = out_flat[:total]
    return out_flat.reshape(orig_shape)


def init_bottleblock_params(key, in_dim, mid_dim, out_dim, dtype=jnp.float32):
    """Deterministic init mirroring the module's __init__.

    The parameters are defined but never used by forward, matching the
    PyTorch reference semantics exactly.
    """
    k1, k2, k3, k4, k5, k6 = jax.random.split(key, 6)
    return {
        # Conv2d(in_dim, mid_dim, kernel_size=1)
        "conv1_w": jax.random.normal(k1, (mid_dim, in_dim, 1, 1), dtype) * 0.05,
        "conv1_b": jax.random.normal(k2, (mid_dim,), dtype) * 0.05,
        # Conv2d(mid_dim, mid_dim, kernel_size=3, padding=0)
        "conv2_w": jax.random.normal(k3, (mid_dim, mid_dim, 3, 3), dtype) * 0.05,
        "conv2_b": jax.random.normal(k4, (mid_dim,), dtype) * 0.05,
        # Conv2d(mid_dim, out_dim, kernel_size=1)
        "conv3_w": jax.random.normal(k5, (out_dim, mid_dim, 1, 1), dtype) * 0.05,
        "conv3_b": jax.random.normal(k6, (out_dim,), dtype) * 0.05,
    }


if __name__ == "__main__":
    key = jax.random.PRNGKey(0)
    kx, kp = jax.random.split(key)

    # Small shapes consistent with the module: N=2, in_dim=4, H=W=16 (NCHW).
    in_dim, mid_dim, out_dim = 4, 8, 16
    x = jax.random.normal(kx, (2, in_dim, 16, 16), jnp.float32)

    params = init_bottleblock_params(kp, in_dim, mid_dim, out_dim)

    y = bottleblock_forward(x, params)
    y = jax.block_until_ready(y)

    assert y.shape == x.shape and y.dtype == x.dtype
    assert bool(jnp.all(y == x))  # forward() is identity in the reference

    # Exercise the padding fallback path too (total not a multiple of 128).
    x_odd = jax.random.normal(kx, (1, 3, 7, 5), jnp.float32)
    y_odd = jax.block_until_ready(bottleblock_forward(x_odd))
    assert y_odd.shape == x_odd.shape and bool(jnp.all(y_odd == x_odd))

    print("KERNEL_OK")
</pallas_src>

<mosaic_0001>
module attributes {stable_mosaic.version = 11 : i64} {
  func.func @_copy_kernel(%arg0: i32, %arg1: memref<8x256xf32, #tpu.memory_space<vmem>>, %arg2: memref<8x256xf32, #tpu.memory_space<vmem>>) attributes {dimension_semantics = [#tpu.dimension_semantics<parallel>], iteration_bounds = array<i64: 1>, scalar_prefetch = 0 : i64, scratch_operands = 0 : i64, tpu.core_type = #tpu.core_type<tc>, window_params = [{transform_indices = @transform_0, window_bounds = array<i64: 8, 256>}, {transform_indices = @transform_1, window_bounds = array<i64: 8, 256>}]} {
    %c0 = arith.constant 0 : index
    %c0_0 = arith.constant 0 : index
    %0 = vector.load %arg1[%c0, %c0_0] : memref<8x256xf32, #tpu.memory_space<vmem>>, vector<8x256xf32>
    %c0_1 = arith.constant 0 : index
    %c0_2 = arith.constant 0 : index
    %1 = vector.load %arg2[%c0_1, %c0_2] : memref<8x256xf32, #tpu.memory_space<vmem>>, vector<8x256xf32>
    tpu.vector_store %arg2[%c0_1, %c0_2], %0 {strides = array<i32>} : memref<8x256xf32, #tpu.memory_space<vmem>>, vector<8x256xf32>,
    return
  }
  func.func @transform_0(%arg0: i32) -> (i32, i32) {
    %c0_i32 = arith.constant 0 : i32
    %c0_i32_0 = arith.constant 0 : i32
    return %arg0, %c0_i32 : i32, i32
  }
  func.func @transform_1(%arg0: i32) -> (i32, i32) {
    %c0_i32 = arith.constant 0 : i32
    %c0_i32_0 = arith.constant 0 : i32
    return %arg0, %c0_i32 : i32, i32
  }
}

</mosaic_0001>

<bundles_post_ra>
// kernel: tpu_custom_call.1
= control target key start
LH: loop header
LB: loop body
LE: loop exit
PB: predicated region body
PF: predicated region fallthrough
CT: control target
= control target key end

     0   :  { %6 = vsyncpa [#allocation3], 0  ;;  %s104_s0 = inlined_call_operand.hbm [shape: f32[8,256], index: 0, kind: input, shape index: {}, may-alias: {0,1}]   ;;  %s105_s1 = inlined_call_operand.hbm [shape: f32[8,256], index: 1, kind: output, shape index: {}, may-alias: {0,1}]  }
   0x1   :  { %7 = vsyncpa [#allocation4], 0  ;;  %s86_s6 = smov [#allocation2]  }
   0x2   :  { %s14_s7 = sshll.u32 %s86_s6, 4  ;;  %s15_s7 = int_to_ptr.vmem [resolvable:$true] %s14_s7 }
   0x3   :  { %s50_s8 = scalar_lea.vmem %s15_s7, 256  ;;  %p55_p1 = scmp.lt.s32.totalorder %s15_s7, %s15_s7 }
   0x4   :  { %p51_p0 = scmp.ne.s32.totalorder %s15_s7, %s50_s8  ;;  %p56_p2 = scmp.lt.s32.totalorder %s50_s8, %s50_s8 }
   0x6   :  { %p57_p3 = por %p56_p2, %p55_p1 }
   0x8   :  { %p58_p4 = pnand %p57_p3, %p51_p0 }
   0xa   :  { %61 = shalt.err (!%p58_p4)
}
   0xb   :  { %17 = dma.hbm_to_vmem [thread:$0]  %s104_s0, 256, %s15_s7, [#allocation3]  }
   0xc   :  { %82 = dma.done.wait [#allocation3], 256  }
   0xd   :  { %83 = vsyncadd [#allocation3], 4294967040  ;;  %s87_s11 = smov [#allocation5]   ;;  %v21_v0 = vld [vmem:[#allocation2] sm:$0xff]  ;;  %v22_v1 = vld [vmem:[#allocation2 + $0x8] sm:$0xff] }
   0xe   :  { %s31_s12 = sshll.u32 %s87_s11, 4  ;;  %23 = vst [vmem:[#allocation5] sm:$0xff] %v21_v0  ;;  %24 = vst [vmem:[#allocation5 + $0x8] sm:$0xff] %v22_v1  ;;  %s32_s12 = int_to_ptr.vmem [resolvable:$true] %s31_s12 }
   0xf   :  { %s62_s13 = scalar_lea.vmem %s32_s12, 256  ;;  %p67_p6 = scmp.lt.s32.totalorder %s32_s12, %s32_s12 }
  0x10   :  { %p63_p5 = scmp.ne.s32.totalorder %s32_s12, %s62_s13  ;;  %p68_p7 = scmp.lt.s32.totalorder %s62_s13, %s62_s13 }
  0x12   :  { %p69_p8 = por %p68_p7, %p67_p6 }
  0x14   :  { %p70_p9 = pnand %p69_p8, %p63_p5 }
  0x16   :  { %73 = shalt.err (!%p70_p9)
}
  0x17   :  { %34 = dma.vmem_to_hbm [thread:$0]  %s32_s12, 256, %s105_s1, [#allocation4]  }
  0x18   :  { %84 = dma.done.wait [#allocation4], 256  }
  0x19   :  { %85 = vsyncadd [#allocation4], 4294967040 }
  0x1a   :  { %38 = vsyncpa [#allocation3], 1 }
  0x1b   :  { %39 = vsyncpa [#allocation4], 1 }

</bundles_post_ra>
